<compile_context>
chip_gen: v5e
topology: v5e:2x2
jax: 0.10.0
libtpu: 0.0.40
codegen_flags: <defaults>
</compile_context>

<pallas_src>
import jax
import jax.numpy as jnp
from jax.experimental import pallas as pl
from jax.experimental.pallas import tpu as pltpu


def _round_up(x, m):
    return (x + m - 1) // m * m


def mlp_kernel(x_ref,
               w1_ref, b1_ref, w2_ref, b2_ref,
               w3_ref, b3_ref, w4_ref, b4_ref,
               w5_ref, b5_ref,
               o_ref):
    """Fused MLP forward for one (tile_m, dim) row-tile of tokens.

    Activations stream in/out as bf16; all matmul operands are bf16
    (MXU-native) with f32 accumulation; bias / ReLU / residual math is f32
    on the VPU.

    NOTE: the w1/w3/w5 matmuls contract over K = dim; with dim = 128 this
    fills only half of the 256-wide MXU K dimension on v6e/v7x — an inherent
    model-shape ceiling (v5e's 128-wide MXU is native for K=128).
    """
    x_bf = x_ref[...]                                  # (tile_m, dim) bf16
    x = x_bf.astype(jnp.float32)

    # Block 1: x = x + linear2(relu(linear1(x)))
    h = jnp.dot(x_bf, w1_ref[...],
                preferred_element_type=jnp.float32) + b1_ref[...]
    h = jnp.maximum(h, 0.0)
    x = x + (jnp.dot(h.astype(jnp.bfloat16), w2_ref[...],
                     preferred_element_type=jnp.float32) + b2_ref[...])

    # Block 2: x = x + linear4(relu(linear3(x)))
    h = jnp.dot(x.astype(jnp.bfloat16), w3_ref[...],
                preferred_element_type=jnp.float32) + b3_ref[...]
    h = jnp.maximum(h, 0.0)
    x = x + (jnp.dot(h.astype(jnp.bfloat16), w4_ref[...],
                     preferred_element_type=jnp.float32) + b4_ref[...])

    # Final projection: linear5(x)
    out = jnp.dot(x.astype(jnp.bfloat16), w5_ref[...],
                  preferred_element_type=jnp.float32) + b5_ref[...]
    o_ref[...] = out.astype(o_ref.dtype)


def _build_call(tile_m, dim, n_pad, weights, biases, vmem_bytes, cost,
                single_buffer_weights):
    """Construct the pallas_call callable (no tracing / execution here)."""
    if single_buffer_weights:
        # Constant index_map across the grid -> weights stay resident; a
        # single buffer avoids useless prefetch descriptors + saves VMEM.
        def wspec(shape):
            return pl.BlockSpec(shape, lambda i: (0, 0),
                                pipeline_mode=pl.Buffered(1))
    else:
        def wspec(shape):
            return pl.BlockSpec(shape, lambda i: (0, 0))

    in_specs = [pl.BlockSpec((tile_m, dim), lambda i: (i, 0))]
    for w, b in zip(weights, biases):
        in_specs.append(wspec(w.shape))
        in_specs.append(wspec(b.shape))

    return pl.pallas_call(
        mlp_kernel,
        out_shape=jax.ShapeDtypeStruct((n_pad, dim), jnp.bfloat16),
        grid_spec=pltpu.PrefetchScalarGridSpec(
            num_scalar_prefetch=0,
            grid=(n_pad // tile_m,),
            in_specs=in_specs,
            out_specs=pl.BlockSpec((tile_m, dim), lambda i: (i, 0)),
        ),
        compiler_params=pltpu.CompilerParams(
            dimension_semantics=("parallel",),
            vmem_limit_bytes=vmem_bytes),
        cost_estimate=cost,
    )


def mlp_forward(x, params, *, tile_m=1024):
    """x: (..., dim). Returns same shape/dtype. Weights (in,out), biases (1,out)."""
    orig_shape = x.shape
    orig_dtype = x.dtype
    dim = orig_shape[-1]
    x2d = x.reshape(-1, dim)
    n = x2d.shape[0]

    (w1, b1, w2, b2, w3, b3, w4, b4, w5, b5) = params
    hid = w1.shape[1]

    # bf16 matmul operands (MXU-native, half the weight DMA/VMEM); f32 biases.
    weights = [w.astype(jnp.bfloat16) for w in (w1, w2, w3, w4, w5)]
    biases = [b.astype(jnp.float32) for b in (b1, b2, b3, b4, b5)]

    # Row tile: as large as requested (amortizes per-grid-step overhead),
    # multiple of 16 (bf16 sublane packing), never bigger than the token count.
    tm = _round_up(max(16, min(tile_m, n)), 16)
    # v7x has 2 TensorCores and the parallel grid axis is what shards work
    # across them: keep >= 2 grid steps whenever two >=16-row tiles exist.
    if n >= 32:
        tm = min(tm, _round_up(pl.cdiv(n, 2), 16))
    n_pad = _round_up(n, tm)

    # Stream activations in bf16 (halves the HBM traffic that dominates on
    # v6e/v7x); residual math is done in f32 inside the kernel.
    x2d = x2d.astype(jnp.bfloat16)
    if n_pad != n:
        x2d = jnp.pad(x2d, ((0, n_pad - n), (0, 0)))

    weight_bytes = sum(int(w.size) * w.dtype.itemsize for w in weights)
    bias_bytes = sum(int(b.size) * b.dtype.itemsize for b in biases)
    act_bytes = 2 * 2 * tm * dim * 2          # bf16 x/out tiles, double-buffered
    inter_bytes = tm * (dim + hid) * 4        # live f32 intermediates
    vmem_bytes = int(1.5 * (act_bytes + 2 * weight_bytes + bias_bytes
                            + inter_bytes))
    # Never below the default scoped limit, never the full 64 MiB of a v7x TC.
    vmem_bytes = min(max(vmem_bytes, 32 * 1024 * 1024), 48 * 1024 * 1024)

    cost = pl.CostEstimate(
        flops=2 * n_pad * (4 * dim * hid + dim * dim),
        transcendentals=0,
        bytes_accessed=2 * n_pad * dim * 2 + weight_bytes + bias_bytes,
    )

    wb_args = []
    for w, b in zip(weights, biases):
        wb_args += [w, b]

    # Capability check for pl.Buffered(1) is trace/compile-only (lower +
    # compile, never execute-and-catch), so genuine runtime failures surface
    # and the kernel never runs twice.
    out2d = None
    if hasattr(pl, "Buffered"):
        try:
            call = _build_call(tm, dim, n_pad, weights, biases, vmem_bytes,
                               cost, single_buffer_weights=True)
            compiled = jax.jit(call).lower(x2d, *wb_args).compile()
        except Exception:
            compiled = None
        if compiled is not None:
            out2d = compiled(x2d, *wb_args)
    if out2d is None:
        call = _build_call(tm, dim, n_pad, weights, biases, vmem_bytes,
                           cost, single_buffer_weights=False)
        out2d = call(x2d, *wb_args)

    if n_pad != n:
        out2d = out2d[:n]
    return out2d.reshape(orig_shape).astype(orig_dtype)


def init_params(key, dim, dtype=jnp.float32):
    """PyTorch-style init: U(-1/sqrt(fan_in), 1/sqrt(fan_in)).
    Weights returned as (in_features, out_features), biases (1, out)."""
    hid = 4 * dim
    shapes = [(dim, hid), (hid, dim), (dim, hid), (hid, dim), (dim, dim)]
    params = []
    for shape in shapes:
        fan_in = shape[0]
        bound = 1.0 / (fan_in ** 0.5)
        key, kw, kb = jax.random.split(key, 3)
        w = jax.random.uniform(kw, shape, dtype, minval=-bound, maxval=bound)
        b = jax.random.uniform(kb, (1, shape[1]), dtype, minval=-bound, maxval=bound)
        params.extend([w, b])
    return tuple(params)


def mlp_reference(x, params):
    (w1, b1, w2, b2, w3, b3, w4, b4, w5, b5) = params
    inter = jax.nn.relu(x @ w1 + b1)
    x = x + (inter @ w2 + b2)
    inter = jax.nn.relu(x @ w3 + b3)
    x = x + (inter @ w4 + b4)
    return x @ w5 + b5


if __name__ == "__main__":
    dim = 128            # lane-dense trailing dim (multiple of 128)
    batch, seq = 2, 8
    key = jax.random.PRNGKey(0)
    kx, kp = jax.random.split(key)

    x = jax.random.normal(kx, (batch, seq, dim), jnp.float32)
    params = init_params(kp, dim)

    out = mlp_forward(x, params)
    out = jax.block_until_ready(out)

    ref = mlp_reference(x.reshape(-1, dim), params).reshape(x.shape)
    assert out.shape == x.shape
    # bf16 activation I/O + bf16 MXU operands (f32 accumulate) -> bf16-level
    # error vs the f32 reference.
    assert jnp.allclose(out, ref, atol=7e-2, rtol=5e-2), "mismatch vs reference"

    # Exercise the padding path (token count not divisible by the row tile).
    x_odd = jax.random.normal(kx, (3, 5, dim), jnp.float32)
    out_odd = jax.block_until_ready(mlp_forward(x_odd, params))
    ref_odd = mlp_reference(x_odd.reshape(-1, dim), params).reshape(x_odd.shape)
    assert out_odd.shape == x_odd.shape
    assert jnp.allclose(out_odd, ref_odd, atol=7e-2, rtol=5e-2), "mismatch (padded)"

    print("KERNEL_OK")
</pallas_src>

<mosaic_0001>
module attributes {stable_mosaic.version = 11 : i64} {
  func.func @mlp_kernel(%arg0: i32, %arg1: memref<16x128xbf16, #tpu.memory_space<vmem>>, %arg2: memref<128x512xbf16, #tpu.memory_space<vmem>>, %arg3: memref<1x512xf32, #tpu.memory_space<vmem>>, %arg4: memref<512x128xbf16, #tpu.memory_space<vmem>>, %arg5: memref<1x128xf32, #tpu.memory_space<vmem>>, %arg6: memref<128x512xbf16, #tpu.memory_space<vmem>>, %arg7: memref<1x512xf32, #tpu.memory_space<vmem>>, %arg8: memref<512x128xbf16, #tpu.memory_space<vmem>>, %arg9: memref<1x128xf32, #tpu.memory_space<vmem>>, %arg10: memref<128x128xbf16, #tpu.memory_space<vmem>>, %arg11: memref<1x128xf32, #tpu.memory_space<vmem>>, %arg12: memref<16x128xbf16, #tpu.memory_space<vmem>>) attributes {dimension_semantics = [#tpu.dimension_semantics<parallel>], iteration_bounds = array<i64: 1>, scalar_prefetch = 0 : i64, scratch_operands = 0 : i64, tpu.core_type = #tpu.core_type<tc>, window_params = [{transform_indices = @transform_0, window_bounds = array<i64: 16, 128>}, {pipeline_mode = #tpu.pipeline_mode<synchronous>, transform_indices = @transform_1, window_bounds = array<i64: 128, 512>}, {pipeline_mode = #tpu.pipeline_mode<synchronous>, transform_indices = @transform_2, window_bounds = array<i64: 1, 512>}, {pipeline_mode = #tpu.pipeline_mode<synchronous>, transform_indices = @transform_3, window_bounds = array<i64: 512, 128>}, {pipeline_mode = #tpu.pipeline_mode<synchronous>, transform_indices = @transform_4, window_bounds = array<i64: 1, 128>}, {pipeline_mode = #tpu.pipeline_mode<synchronous>, transform_indices = @transform_5, window_bounds = array<i64: 128, 512>}, {pipeline_mode = #tpu.pipeline_mode<synchronous>, transform_indices = @transform_6, window_bounds = array<i64: 1, 512>}, {pipeline_mode = #tpu.pipeline_mode<synchronous>, transform_indices = @transform_7, window_bounds = array<i64: 512, 128>}, {pipeline_mode = #tpu.pipeline_mode<synchronous>, transform_indices = @transform_8, window_bounds = array<i64: 1, 128>}, {pipeline_mode = #tpu.pipeline_mode<synchronous>, transform_indices = @transform_9, window_bounds = array<i64: 128, 128>}, {pipeline_mode = #tpu.pipeline_mode<synchronous>, transform_indices = @transform_10, window_bounds = array<i64: 1, 128>}, {transform_indices = @transform_11, window_bounds = array<i64: 16, 128>}]} {
    %c0 = arith.constant 0 : index
    %c0_0 = arith.constant 0 : index
    %0 = vector.load %arg1[%c0, %c0_0] : memref<16x128xbf16, #tpu.memory_space<vmem>>, vector<16x128xbf16>
    %1 = arith.extf %0 : vector<16x128xbf16> to vector<16x128xf32>
    %c0_1 = arith.constant 0 : index
    %c0_2 = arith.constant 0 : index
    %2 = vector.load %arg2[%c0_1, %c0_2] : memref<128x512xbf16, #tpu.memory_space<vmem>>, vector<128x512xbf16>
    %cst = arith.constant dense<0.000000e+00> : vector<16x512xf32>
    %3 = tpu.matmul %0, %2, %cst {dimension_numbers = #tpu.dot_dimension_numbers<[1], [0], [0], [1], [0, 0, 1, 1], [], []>} : vector<16x128xbf16>, vector<128x512xbf16>, vector<16x512xf32> -> vector<16x512xf32>
    %c0_3 = arith.constant 0 : index
    %c0_4 = arith.constant 0 : index
    %4 = vector.load %arg3[%c0_3, %c0_4] : memref<1x512xf32, #tpu.memory_space<vmem>>, vector<1x512xf32>
    %5 = vector.broadcast %4 : vector<1x512xf32> to vector<16x512xf32>
    %6 = arith.addf %3, %5 : vector<16x512xf32>
    %cst_5 = arith.constant 0.000000e+00 : f32
    %7 = vector.broadcast %cst_5 : f32 to vector<16x512xf32>
    %8 = arith.maximumf %6, %7 : vector<16x512xf32>
    %9 = arith.truncf %8 : vector<16x512xf32> to vector<16x512xbf16>
    %c0_6 = arith.constant 0 : index
    %c0_7 = arith.constant 0 : index
    %10 = vector.load %arg4[%c0_6, %c0_7] : memref<512x128xbf16, #tpu.memory_space<vmem>>, vector<512x128xbf16>
    %cst_8 = arith.constant dense<0.000000e+00> : vector<16x128xf32>
    %11 = tpu.matmul %9, %10, %cst_8 {dimension_numbers = #tpu.dot_dimension_numbers<[1], [0], [0], [1], [0, 0, 1, 1], [], []>} : vector<16x512xbf16>, vector<512x128xbf16>, vector<16x128xf32> -> vector<16x128xf32>
    %c0_9 = arith.constant 0 : index
    %c0_10 = arith.constant 0 : index
    %12 = vector.load %arg5[%c0_9, %c0_10] : memref<1x128xf32, #tpu.memory_space<vmem>>, vector<1x128xf32>
    %13 = vector.broadcast %12 : vector<1x128xf32> to vector<16x128xf32>
    %14 = arith.addf %11, %13 : vector<16x128xf32>
    %15 = arith.addf %1, %14 : vector<16x128xf32>
    %16 = arith.truncf %15 : vector<16x128xf32> to vector<16x128xbf16>
    %c0_11 = arith.constant 0 : index
    %c0_12 = arith.constant 0 : index
    %17 = vector.load %arg6[%c0_11, %c0_12] : memref<128x512xbf16, #tpu.memory_space<vmem>>, vector<128x512xbf16>
    %cst_13 = arith.constant dense<0.000000e+00> : vector<16x512xf32>
    %18 = tpu.matmul %16, %17, %cst_13 {dimension_numbers = #tpu.dot_dimension_numbers<[1], [0], [0], [1], [0, 0, 1, 1], [], []>} : vector<16x128xbf16>, vector<128x512xbf16>, vector<16x512xf32> -> vector<16x512xf32>
    %c0_14 = arith.constant 0 : index
    %c0_15 = arith.constant 0 : index
    %19 = vector.load %arg7[%c0_14, %c0_15] : memref<1x512xf32, #tpu.memory_space<vmem>>, vector<1x512xf32>
    %20 = vector.broadcast %19 : vector<1x512xf32> to vector<16x512xf32>
    %21 = arith.addf %18, %20 : vector<16x512xf32>
    %cst_16 = arith.constant 0.000000e+00 : f32
    %22 = vector.broadcast %cst_16 : f32 to vector<16x512xf32>
    %23 = arith.maximumf %21, %22 : vector<16x512xf32>
    %24 = arith.truncf %23 : vector<16x512xf32> to vector<16x512xbf16>
    %c0_17 = arith.constant 0 : index
    %c0_18 = arith.constant 0 : index
    %25 = vector.load %arg8[%c0_17, %c0_18] : memref<512x128xbf16, #tpu.memory_space<vmem>>, vector<512x128xbf16>
    %cst_19 = arith.constant dense<0.000000e+00> : vector<16x128xf32>
    %26 = tpu.matmul %24, %25, %cst_19 {dimension_numbers = #tpu.dot_dimension_numbers<[1], [0], [0], [1], [0, 0, 1, 1], [], []>} : vector<16x512xbf16>, vector<512x128xbf16>, vector<16x128xf32> -> vector<16x128xf32>
    %c0_20 = arith.constant 0 : index
    %c0_21 = arith.constant 0 : index
    %27 = vector.load %arg9[%c0_20, %c0_21] : memref<1x128xf32, #tpu.memory_space<vmem>>, vector<1x128xf32>
    %28 = vector.broadcast %27 : vector<1x128xf32> to vector<16x128xf32>
    %29 = arith.addf %26, %28 : vector<16x128xf32>
    %30 = arith.addf %15, %29 : vector<16x128xf32>
    %31 = arith.truncf %30 : vector<16x128xf32> to vector<16x128xbf16>
    %c0_22 = arith.constant 0 : index
    %c0_23 = arith.constant 0 : index
    %32 = vector.load %arg10[%c0_22, %c0_23] : memref<128x128xbf16, #tpu.memory_space<vmem>>, vector<128x128xbf16>
    %cst_24 = arith.constant dense<0.000000e+00> : vector<16x128xf32>
    %33 = tpu.matmul %31, %32, %cst_24 {dimension_numbers = #tpu.dot_dimension_numbers<[1], [0], [0], [1], [0, 0, 1, 1], [], []>} : vector<16x128xbf16>, vector<128x128xbf16>, vector<16x128xf32> -> vector<16x128xf32>
    %c0_25 = arith.constant 0 : index
    %c0_26 = arith.constant 0 : index
    %34 = vector.load %arg11[%c0_25, %c0_26] : memref<1x128xf32, #tpu.memory_space<vmem>>, vector<1x128xf32>
    %35 = vector.broadcast %34 : vector<1x128xf32> to vector<16x128xf32>
    %36 = arith.addf %33, %35 : vector<16x128xf32>
    %37 = arith.truncf %36 : vector<16x128xf32> to vector<16x128xbf16>
    %c0_27 = arith.constant 0 : index
    %c0_28 = arith.constant 0 : index
    %38 = vector.load %arg12[%c0_27, %c0_28] : memref<16x128xbf16, #tpu.memory_space<vmem>>, vector<16x128xbf16>
    tpu.vector_store %arg12[%c0_27, %c0_28], %37 {strides = array<i32>} : memref<16x128xbf16, #tpu.memory_space<vmem>>, vector<16x128xbf16>,
    return
  }
  func.func @transform_0(%arg0: i32) -> (i32, i32) {
    %c0_i32 = arith.constant 0 : i32
    %c0_i32_0 = arith.constant 0 : i32
    return %arg0, %c0_i32 : i32, i32
  }
  func.func @transform_1(%arg0: i32) -> (i32, i32) {
    %c0_i32 = arith.constant 0 : i32
    %c0_i32_0 = arith.constant 0 : i32
    %c0_i32_1 = arith.constant 0 : i32
    return %c0_i32, %c0_i32_0 : i32, i32
  }
  func.func @transform_2(%arg0: i32) -> (i32, i32) {
    %c0_i32 = arith.constant 0 : i32
    %c0_i32_0 = arith.constant 0 : i32
    %c0_i32_1 = arith.constant 0 : i32
    return %c0_i32, %c0_i32_0 : i32, i32
  }
  func.func @transform_3(%arg0: i32) -> (i32, i32) {
    %c0_i32 = arith.constant 0 : i32
    %c0_i32_0 = arith.constant 0 : i32
    %c0_i32_1 = arith.constant 0 : i32
    return %c0_i32, %c0_i32_0 : i32, i32
  }
  func.func @transform_4(%arg0: i32) -> (i32, i32) {
    %c0_i32 = arith.constant 0 : i32
    %c0_i32_0 = arith.constant 0 : i32
    %c0_i32_1 = arith.constant 0 : i32
    return %c0_i32, %c0_i32_0 : i32, i32
  }
  func.func @transform_5(%arg0: i32) -> (i32, i32) {
    %c0_i32 = arith.constant 0 : i32
    %c0_i32_0 = arith.constant 0 : i32
    %c0_i32_1 = arith.constant 0 : i32
    return %c0_i32, %c0_i32_0 : i32, i32
  }
  func.func @transform_6(%arg0: i32) -> (i32, i32) {
    %c0_i32 = arith.constant 0 : i32
    %c0_i32_0 = arith.constant 0 : i32
    %c0_i32_1 = arith.constant 0 : i32
    return %c0_i32, %c0_i32_0 : i32, i32
  }
  func.func @transform_7(%arg0: i32) -> (i32, i32) {
    %c0_i32 = arith.constant 0 : i32
    %c0_i32_0 = arith.constant 0 : i32
    %c0_i32_1 = arith.constant 0 : i32
    return %c0_i32, %c0_i32_0 : i32, i32
  }
  func.func @transform_8(%arg0: i32) -> (i32, i32) {
    %c0_i32 = arith.constant 0 : i32
    %c0_i32_0 = arith.constant 0 : i32
    %c0_i32_1 = arith.constant 0 : i32
    return %c0_i32, %c0_i32_0 : i32, i32
  }
  func.func @transform_9(%arg0: i32) -> (i32, i32) {
    %c0_i32 = arith.constant 0 : i32
    %c0_i32_0 = arith.constant 0 : i32
    %c0_i32_1 = arith.constant 0 : i32
    return %c0_i32, %c0_i32_0 : i32, i32
  }
  func.func @transform_10(%arg0: i32) -> (i32, i32) {
    %c0_i32 = arith.constant 0 : i32
    %c0_i32_0 = arith.constant 0 : i32
    %c0_i32_1 = arith.constant 0 : i32
    return %c0_i32, %c0_i32_0 : i32, i32
  }
  func.func @transform_11(%arg0: i32) -> (i32, i32) {
    %c0_i32 = arith.constant 0 : i32
    %c0_i32_0 = arith.constant 0 : i32
    return %arg0, %c0_i32 : i32, i32
  }
}

</mosaic_0001>

<bundles_post_ra>
// kernel: tpu_custom_call.1
= control target key start
LH: loop header
LB: loop body
LE: loop exit
PB: predicated region body
PF: predicated region fallthrough
CT: control target
= control target key end

     0   :  { %16 = vsyncpa [#allocation3], 0  ;;  %s2486_s0 = inlined_call_operand.hbm [shape: bf16[16,128], index: 0, kind: input, shape index: {}]   ;;  %s2487_s1 = inlined_call_operand.hbm [shape: bf16[128,512], index: 1, kind: input, shape index: {}]   ;;  %s2488_s2 = inlined_call_operand.hbm [shape: f32[1,512], index: 2, kind: input, shape index: {}]   ;;  %s2489_s3 = inlined_call_operand.hbm [shape: bf16[512,128], index: 3, kind: input, shape index: {}]   ;;  %s2490_s4 = inlined_call_operand.vmem [shape: f32[1,128], index: 4, kind: input, shape index: {}]   ;;  %s2491_s5 = inlined_call_operand.hbm [shape: bf16[128,512], index: 5, kind: input, shape index: {}]   ;;  %s2492_s6 = inlined_call_operand.vmem [shape: f32[1,512], index: 6, kind: input, shape index: {}]   ;;  %s2493_s7 = inlined_call_operand.hbm [shape: bf16[512,128], index: 7, kind: input, shape index: {}]   ;;  %s2494_s8 = inlined_call_operand.vmem [shape: f32[1,128], index: 8, kind: input, shape index: {}]   ;;  %s2495_s9 = inlined_call_operand.hbm [shape: bf16[128,128], index: 9, kind: input, shape index: {}]   ;;  %s2496_s10 = inlined_call_operand.vmem [shape: f32[1,128], index: 10, kind: input, shape index: {}]   ;;  %s2497_s11 = inlined_call_operand.hbm [shape: bf16[16,128], index: 11, kind: output, shape index: {}]  }
   0x1   :  { %17 = vsyncpa [#allocation6], 0 }
   0x2   :  { %18 = vsyncpa [#allocation9], 0 }
   0x3   :  { %19 = vsyncpa [#allocation12], 0  ;;  %s38_s19 = sshll.u32 %s2487_s1, 4  ;;  %s39_s19 = int_to_ptr.hbm [resolvable:$true] %s38_s19 }
   0x4   :  { %20 = vsyncpa [#allocation4], 0  ;;  %s2349_s20 = smov [#allocation5]   ;;  %s2350_s22 = smov 256  }
   0x5   :  { %s40_s21 = sshll.u32 %s2349_s20, 4  ;;  %s2351_s23 = smov 16   ;;  %s41_s21 = int_to_ptr.vmem [resolvable:$true] %s40_s21 }
   0x6   :  { %46 = dma.hbm_to_vmem [thread:$0]  %s39_s19, 4096, %s41_s21, [#allocation6], %s2350_s22, %s2350_s22, %s2351_s23  }
   0x7   :  { %s62_s26 = sshll.u32 %s2489_s3, 4  ;;  %s2352_s27 = smov [#allocation8]   ;;  %s63_s26 = int_to_ptr.hbm [resolvable:$true] %s62_s26 }
   0x8   :  { %s64_s28 = sshll.u32 %s2352_s27, 4  ;;  %s92_s30 = sshll.u32 %s2493_s7, 4  ;;  %s65_s28 = int_to_ptr.vmem [resolvable:$true] %s64_s28  ;;  %s93_s30 = int_to_ptr.hbm [resolvable:$true] %s92_s30 }
   0x9   :  { %s2353_s12 = smov 64   ;;  %s2354_s13 = smov 4  }
   0xa   :  { %70 = dma.hbm_to_vmem [thread:$0]  %s63_s26, 4096, %s65_s28, [#allocation9], %s2353_s12, %s2353_s12, %s2354_s13  }
   0xb   :  { %s25_s16 = sshll.u32 %s2486_s0, 4  ;;  %s2355_s3 = smov [#allocation11]   ;;  %s26_s16 = int_to_ptr.hbm [resolvable:$true] %s25_s16 }
   0xc   :  { %s94_s17 = sshll.u32 %s2355_s3, 4  ;;  %s2356_s7 = smov [#allocation2]   ;;  %s95_s17 = int_to_ptr.vmem [resolvable:$true] %s94_s17 }
   0xd   :  { %100 = dma.hbm_to_vmem [thread:$0]  %s93_s30, 4096, %s95_s17, [#allocation12], %s2353_s12, %s2353_s12, %s2354_s13  }
   0xe   :  { %s27_s18 = sshll.u32 %s2356_s7, 4  ;;  %s52_s21 = sshll.u32 %s2488_s2, 4  ;;  %s28_s18 = int_to_ptr.vmem [resolvable:$true] %s27_s18  ;;  %s53_s21 = int_to_ptr.hbm [resolvable:$true] %s52_s21 }
   0xf   :  { %33 = dma.hbm_to_vmem [thread:$0]  %s26_s16, 128, %s28_s18, [#allocation3], %s2353_s12, %s2353_s12, %s2354_s13  }
  0x10   :  { %s77_s25 = sshll.u32 %s2491_s5, 4  ;;  %s2357_s26 = smov [#allocation7]   ;;  %s78_s25 = int_to_ptr.hbm [resolvable:$true] %s77_s25 }
  0x11   :  { %s54_s27 = sshll.u32 %s2357_s26, 4  ;;  %s2358_s28 = smov [#allocation10]   ;;  %s55_s27 = int_to_ptr.vmem [resolvable:$true] %s54_s27 }
  0x12   :  { %57 = dma.hbm_to_vmem [thread:$0]  %s53_s21, 64, %s55_s27, [#allocation6]  }
  0x13   :  { %s79_s29 = sshll.u32 %s2358_s28, 4  ;;  %s107_s2 = sshll.u32 %s2495_s9, 4  ;;  %s80_s29 = int_to_ptr.vmem [resolvable:$true] %s79_s29  ;;  %s108_s2 = int_to_ptr.hbm [resolvable:$true] %s107_s2 }
  0x14   :  { %85 = dma.hbm_to_vmem [thread:$0]  %s78_s25, 4096, %s80_s29, [#allocation9], %s2350_s22, %s2350_s22, %s2351_s23  }
  0x15   :  { %s2359_s14 = smov [#allocation13]  }
  0x16   :  { %s109_s15 = sshll.u32 %s2359_s14, 4  ;;  %s110_s15 = int_to_ptr.vmem [resolvable:$true] %s109_s15 }
  0x17   :  { %115 = dma.hbm_to_vmem [thread:$0]  %s108_s2, 1024, %s110_s15, [#allocation12], %s2353_s12, %s2353_s12, %s2354_s13  }
  0x18   :  { %2339 = dma.done.wait [#allocation3], 128  }
  0x19   :  { %2340 = vsyncadd [#allocation3], 4294967168 }
  0x1a   :  { %2341 = dma.done.wait [#allocation6], 4160  }
  0x1b   :  { %2342 = vsyncadd [#allocation6], 4294963136 }
  0x1c   :  { %2343 = dma.done.wait [#allocation9], 8192  }
  0x1d   :  { %2344 = vsyncadd [#allocation9], 4294959104 }
  0x1e   :  { %2345 = dma.done.wait [#allocation12], 5120  }
  0x1f   :  { %2346 = vsyncadd [#allocation12], 4294962176  ;;  %v1560_v0 = vld [vmem:[#allocation5 + $0xe0] sm:$0xf]  ;;  %v2021_v1 = vld [vmem:[#allocation5 + $0xec] sm:$0xf0] }
  0x20   :  { %v2019_v2 = vld [vmem:[#allocation5 + $0xe4] sm:$0xf]  ;;  %v1561_v3 = vor.u32 %v2021_v1, %v1560_v0  ;;  %v1562_v4 = vld [vmem:[#allocation5 + $0xf0] sm:$0xf0]  ;;  %v1568_v5 = vld [vmem:[#allocation5 + $0xe8] sm:$0xf] }
  0x21   :  { %v2022_v6 = vld [vmem:[#allocation5 + $0xf4] sm:$0xf0]  ;;  %v1565_v7 = vor.u32 %v2019_v2, %v1562_v4  ;;  %v2020_v9 = vld [vmem:[#allocation5 + $0xec] sm:$0xf]  ;;  %v1570_v10 = vld [vmem:[#allocation5 + $0xf8] sm:$0xf0] }
  0x22   :  { %v1569_v8 = vor.u32 %v2022_v6, %v1568_v5  ;;  %v1544_v11 = vld [vmem:[#allocation5 + $0xc0] sm:$0xf]  ;;  %358 = vmatpush.bf16.msra.mxu0 %v1561_v3  ;;  %v1573_v12 = vor.u32 %v2020_v9, %v1570_v10  ;;  %v2017_v13 = vld [vmem:[#allocation5 + $0xcc] sm:$0xf0]  ;;  %v2015_v14 = vld [vmem:[#allocation5 + $0xc4] sm:$0xf] }
  0x23   :  { %v1546_v15 = vld [vmem:[#allocation5 + $0xd0] sm:$0xf0]  ;;  %372 = vmatpush.bf16.msra.mxu1 %v1565_v7  ;;  %v1545_v16 = vor.u32 %v2017_v13, %v1544_v11  ;;  %v1552_v18 = vld [vmem:[#allocation5 + $0xc8] sm:$0xf]  ;;  %v2018_v19 = vld [vmem:[#allocation5 + $0xd4] sm:$0xf0] }
  0x24   :  { %386 = vmatpush.bf16.msra.mxu2 %v1569_v8  ;;  %v1549_v17 = vor.u32 %v2015_v14, %v1546_v15  ;;  %v2016_v20 = vld [vmem:[#allocation5 + $0xcc] sm:$0xf]  ;;  %400 = vmatpush.bf16.msra.mxu3 %v1573_v12  ;;  %v1553_v21 = vor.u32 %v2018_v19, %v1552_v18  ;;  %v1554_v22 = vld [vmem:[#allocation5 + $0xd8] sm:$0xf0]  ;;  %v1528_v23 = vld [vmem:[#allocation5 + $0xa0] sm:$0xf] }
  0x25   :  { %v2013_v24 = vld [vmem:[#allocation5 + $0xac] sm:$0xf0]  ;;  %v1557_v25 = vor.u32 %v2016_v20, %v1554_v22  ;;  %v2011_v26 = vld [vmem:[#allocation5 + $0xa4] sm:$0xf]  ;;  %v1530_v27 = vld [vmem:[#allocation5 + $0xb0] sm:$0xf0] }
  0x26   :  { %v1536_v28 = vld [vmem:[#allocation5 + $0xa8] sm:$0xf]  ;;  %359 = vmatpush.bf16.msra.mxu0 %v1545_v16  ;;  %v1529_v29 = vor.u32 %v2013_v24, %v1528_v23  ;;  %v2014_v30 = vld [vmem:[#allocation5 + $0xb4] sm:$0xf0]  ;;  %v2012_v31 = vld [vmem:[#allocation5 + $0xac] sm:$0xf]  ;;  %v1533_v33 = vor.u32 %v2011_v26, %v1530_v27 }
  0x27   :  { %v1538_v32 = vld [vmem:[#allocation5 + $0xb8] sm:$0xf0]  ;;  %373 = vmatpush.bf16.msra.mxu1 %v1549_v17  ;;  %v1537_v34 = vor.u32 %v2014_v30, %v1536_v28  ;;  %v1512_v35 = vld [vmem:[#allocation5 + $0x80] sm:$0xf]  ;;  %v2009_v36 = vld [vmem:[#allocation5 + $0x8c] sm:$0xf0] }
  0x28   :  { %387 = vmatpush.bf16.msra.mxu2 %v1553_v21  ;;  %v2007_v37 = vld [vmem:[#allocation5 + $0x84] sm:$0xf]  ;;  %401 = vmatpush.bf16.msra.mxu3 %v1557_v25  ;;  %v1541_v38 = vor.u32 %v2012_v31, %v1538_v32  ;;  %v1514_v39 = vld [vmem:[#allocation5 + $0x90] sm:$0xf0]  ;;  %v1520_v40 = vld [vmem:[#allocation5 + $0x88] sm:$0xf]  ;;  %v1513_v44 = vor.u32 %v2009_v36, %v1512_v35 }
  0x29   :  { %v2010_v41 = vld [vmem:[#allocation5 + $0x94] sm:$0xf0]  ;;  %v2008_v42 = vld [vmem:[#allocation5 + $0x8c] sm:$0xf]  ;;  %v1522_v43 = vld [vmem:[#allocation5 + $0x98] sm:$0xf0]  ;;  %v1517_v45 = vor.u32 %v2007_v37, %v1514_v39 }
  0x2a   :  { %360 = vmatpush.bf16.msra.mxu0 %v1529_v29  ;;  %v1521_v46 = vor.u32 %v2010_v41, %v1520_v40  ;;  %v1496_v47 = vld [vmem:[#allocation5 + $0x60] sm:$0xf]  ;;  %v2005_v48 = vld [vmem:[#allocation5 + $0x6c] sm:$0xf0]  ;;  %v2003_v49 = vld [vmem:[#allocation5 + $0x64] sm:$0xf]  ;;  %v1525_v50 = vor.u32 %v2008_v42, %v1522_v43 }
  0x2b   :  { %374 = vmatpush.bf16.msra.mxu1 %v1533_v33  ;;  %v1498_v51 = vld [vmem:[#allocation5 + $0x70] sm:$0xf0]  ;;  %v1504_v52 = vld [vmem:[#allocation5 + $0x68] sm:$0xf]  ;;  %v2006_v53 = vld [vmem:[#allocation5 + $0x74] sm:$0xf0]  ;;  %v1497_v56 = vor.u32 %v2005_v48, %v1496_v47 }
  0x2c   :  { %388 = vmatpush.bf16.msra.mxu2 %v1537_v34  ;;  %402 = vmatpush.bf16.msra.mxu3 %v1541_v38  ;;  %v2004_v54 = vld [vmem:[#allocation5 + $0x6c] sm:$0xf]  ;;  %v1506_v55 = vld [vmem:[#allocation5 + $0x78] sm:$0xf0]  ;;  %v1501_v57 = vor.u32 %v2003_v49, %v1498_v51  ;;  %v1505_v58 = vor.u32 %v2006_v53, %v1504_v52  ;;  %v1480_v59 = vld [vmem:[#allocation5 + $0x40] sm:$0xf] }
  0x2d   :  { %v2001_v60 = vld [vmem:[#allocation5 + $0x4c] sm:$0xf0]  ;;  %v1999_v61 = vld [vmem:[#allocation5 + $0x44] sm:$0xf]  ;;  %v1509_v62 = vor.u32 %v2004_v54, %v1506_v55  ;;  %v1482_v63 = vld [vmem:[#allocation5 + $0x50] sm:$0xf0] }
  0x2e   :  { %361 = vmatpush.bf16.msra.mxu0 %v1513_v44  ;;  %v1488_v0 = vld [vmem:[#allocation5 + $0x48] sm:$0xf]  ;;  %v2002_v1 = vld [vmem:[#allocation5 + $0x54] sm:$0xf0]  ;;  %v2000_v2 = vld [vmem:[#allocation5 + $0x4c] sm:$0xf]  ;;  %v1481_v4 = vor.u32 %v2001_v60, %v1480_v59  ;;  %v1485_v5 = vor.u32 %v1999_v61, %v1482_v63 }
  0x2f   :  { %375 = vmatpush.bf16.msra.mxu1 %v1517_v45  ;;  %v1490_v3 = vld [vmem:[#allocation5 + $0x58] sm:$0xf0]  ;;  %v1489_v6 = vor.u32 %v2002_v1, %v1488_v0  ;;  %v1464_v7 = vld [vmem:[#allocation5 + $0x20] sm:$0xf]  ;;  %v1997_v8 = vld [vmem:[#allocation5 + $0x2c] sm:$0xf0] }
  0x30   :  { %389 = vmatpush.bf16.msra.mxu2 %v1521_v46  ;;  %403 = vmatpush.bf16.msra.mxu3 %v1525_v50  ;;  %v1995_v9 = vld [vmem:[#allocation5 + $0x24] sm:$0xf]  ;;  %v1493_v10 = vor.u32 %v2000_v2, %v1490_v3  ;;  %v1466_v11 = vld [vmem:[#allocation5 + $0x30] sm:$0xf0]  ;;  %v1472_v12 = vld [vmem:[#allocation5 + $0x28] sm:$0xf]  ;;  %v1465_v16 = vor.u32 %v1997_v8, %v1464_v7 }
  0x31   :  { %v1998_v13 = vld [vmem:[#allocation5 + $0x34] sm:$0xf0]  ;;  %v1996_v14 = vld [vmem:[#allocation5 + $0x2c] sm:$0xf]  ;;  %v1474_v15 = vld [vmem:[#allocation5 + $0x38] sm:$0xf0]  ;;  %v1469_v17 = vor.u32 %v1995_v9, %v1466_v11 }
  0x32   :  { %362 = vmatpush.bf16.msra.mxu0 %v1497_v56  ;;  %v1473_v18 = vor.u32 %v1998_v13, %v1472_v12  ;;  %v1448_v19 = vld [vmem:[#allocation5] sm:$0xf]  ;;  %v1993_v20 = vld [vmem:[#allocation5 + $0xc] sm:$0xf0]  ;;  %v1991_v21 = vld [vmem:[#allocation5 + $0x4] sm:$0xf]  ;;  %v1477_v22 = vor.u32 %v1996_v14, %v1474_v15 }
  0x33   :  { %376 = vmatpush.bf16.msra.mxu1 %v1501_v57  ;;  %v1450_v23 = vld [vmem:[#allocation5 + $0x10] sm:$0xf0]  ;;  %v1456_v24 = vld [vmem:[#allocation5 + $0x8] sm:$0xf]  ;;  %v1994_v25 = vld [vmem:[#allocation5 + $0x14] sm:$0xf0]  ;;  %v1449_v28 = vor.u32 %v1993_v20, %v1448_v19 }
  0x34   :  { %390 = vmatpush.bf16.msra.mxu2 %v1505_v58  ;;  %404 = vmatpush.bf16.msra.mxu3 %v1509_v62  ;;  %v1992_v26 = vld [vmem:[#allocation5 + $0xc] sm:$0xf]  ;;  %v1458_v27 = vld [vmem:[#allocation5 + $0x18] sm:$0xf0]  ;;  %v1453_v29 = vor.u32 %v1991_v21, %v1450_v23  ;;  %v1457_v30 = vor.u32 %v1994_v25, %v1456_v24  ;;  %v2029_v36 = vld [vmem:[#allocation8 + $0x30] sm:$0xff]  ;;  %s2360_s3 = smov [#allocation14]  }
  0x35   :  { %v1461_v31 = vor.u32 %v1992_v26, %v1458_v27  ;;  %v2030_v32 = vld [vmem:[#allocation8 + $0x38] sm:$0xff]  ;;  %v2037_v38 = vld [vmem:[#allocation8 + $0x70] sm:$0xff]  ;;  %v2028_v40 = vld [vmem:[#allocation8 + $0x28] sm:$0xff]  ;;  %s1424_s17 = sshll.u32 %s2360_s3, 4  ;;  %s1426_s19 = sshll.u32 %s2497_s11, 4  ;;  %s1425_s17 = int_to_ptr.vmem [resolvable:$true] %s1424_s17  ;;  %s1427_s19 = int_to_ptr.hbm [resolvable:$true] %s1426_s19 }
  0x36   :  { %363 = vmatpush.bf16.msra.mxu0 %v1481_v4  ;;  %v1990_v33 = vld [vmem:[#allocation2] sm:$0xff]  ;;  %v2036_v42 = vld [vmem:[#allocation8 + $0x68] sm:$0xff]  ;;  %v2027_v44 = vld [vmem:[#allocation8 + $0x20] sm:$0xff] }
  0x37   :  { %377 = vmatpush.bf16.msra.mxu1 %v1485_v5  ;;  %v2038_v34 = vld [vmem:[#allocation8 + $0x78] sm:$0xff]  ;;  %v2045_v39 = vld [vmem:[#allocation8 + $0xb0] sm:$0xff]  ;;  %v2044_v43 = vld [vmem:[#allocation8 + $0xa8] sm:$0xff] }
  0x38   :  { %391 = vmatpush.bf16.msra.mxu2 %v1489_v6  ;;  %405 = vmatpush.bf16.msra.mxu3 %v1493_v10  ;;  %v2046_v35 = vld [vmem:[#allocation8 + $0xb8] sm:$0xff]  ;;  %v2053_v41 = vld [vmem:[#allocation8 + $0xf0] sm:$0xff]  ;;  %v2052_v45 = vld [vmem:[#allocation8 + $0xe8] sm:$0xff] }
  0x39   :  { %v2054_v37 = vld [vmem:[#allocation8 + $0xf8] sm:$0xff]  ;;  %v2035_v46 = vld [vmem:[#allocation8 + $0x60] sm:$0xff]  ;;  %v2025_v51 = vld [vmem:[#allocation8 + $0x10] sm:$0xff] }
  0x3a   :  { %364 = vmatpush.bf16.msra.mxu0 %v1465_v16  ;;  %v2026_v47 = vld [vmem:[#allocation8 + $0x18] sm:$0xff]  ;;  %v2043_v49 = vld [vmem:[#allocation8 + $0xa0] sm:$0xff]  ;;  %v2033_v52 = vld [vmem:[#allocation8 + $0x50] sm:$0xff] }
  0x3b   :  { %378 = vmatpush.bf16.msra.mxu1 %v1469_v17  ;;  %v2034_v48 = vld [vmem:[#allocation8 + $0x58] sm:$0xff]  ;;  %v2051_v50 = vld [vmem:[#allocation8 + $0xe0] sm:$0xff]  ;;  %v2024_v55 = vld [vmem:[#allocation8 + $0x8] sm:$0xff] }
  0x3c   :  { %392 = vmatpush.bf16.msra.mxu2 %v1473_v18  ;;  %406 = vmatpush.bf16.msra.mxu3 %v1477_v22  ;;  %v2042_v53 = vld [vmem:[#allocation8 + $0x98] sm:$0xff]  ;;  %v2032_v56 = vld [vmem:[#allocation8 + $0x48] sm:$0xff]  ;;  %v2041_v57 = vld [vmem:[#allocation8 + $0x90] sm:$0xff] }
  0x3d   :  { %v2050_v54 = vld [vmem:[#allocation8 + $0xd8] sm:$0xff]  ;;  %v2049_v58 = vld [vmem:[#allocation8 + $0xd0] sm:$0xff]  ;;  %v2023_v59 = vld [vmem:[#allocation8] sm:$0xff] }
  0x3e   :  { %365 = vmatpush.bf16.msra.mxu0 %v1449_v28  ;;  %v2031_v60 = vld [vmem:[#allocation8 + $0x40] sm:$0xff]  ;;  %v2040_v61 = vld [vmem:[#allocation8 + $0x88] sm:$0xff]  ;;  %v2085_v2 = vld [vmem:[#allocation10 + $0xec] sm:$0xf0] }
  0x3f   :  { %379 = vmatpush.bf16.msra.mxu1 %v1453_v29  ;;  %v2048_v62 = vld [vmem:[#allocation8 + $0xc8] sm:$0xff]  ;;  %v2039_v63 = vld [vmem:[#allocation8 + $0x80] sm:$0xff]  ;;  %v1818_v5 = vld [vmem:[#allocation10 + $0xf0] sm:$0xf0] }
  0x40   :  { %393 = vmatpush.bf16.msra.mxu2 %v1457_v30  ;;  %407 = vmatpush.bf16.msra.mxu3 %v1461_v31  ;;  %v2047_v0 = vld [vmem:[#allocation8 + $0xc0] sm:$0xff]  ;;  %v1824_v6 = vld [vmem:[#allocation10 + $0xe8] sm:$0xf]  ;;  %v2086_v7 = vld [vmem:[#allocation10 + $0xf4] sm:$0xf0] }
  0x41   :  { %366 = vmatmul.bf16.vlgmr.msra.gmra.mxu0 %v1990_v33  ;;  %v1816_v1 = vld [vmem:[#allocation10 + $0xe0] sm:$0xf]  ;;  %v2083_v3 = vld [vmem:[#allocation10 + $0xe4] sm:$0xf]  ;;  %v1825_v9 = vor.u32 %v2086_v7, %v1824_v6  ;;  %v2084_v10 = vld [vmem:[#allocation10 + $0xec] sm:$0xf] }
  0x42   :  { %686 = vmatpush.bf16.msrb.mxu0 %v2030_v32  ;;  %380 = vmatmul.bf16.vlgmr.msra.gmra.mxu1 %v1990_v33  ;;  %v1817_v4 = vor.u32 %v2085_v2, %v1816_v1  ;;  %v1821_v8 = vor.u32 %v2083_v3, %v1818_v5  ;;  %v1826_v11 = vld [vmem:[#allocation10 + $0xf8] sm:$0xf0]  ;;  %v2078_v1 = vld [vmem:[#allocation10 + $0xb4] sm:$0xf0]  ;;  %v2076_v2 = vld [vmem:[#allocation10 + $0xac] sm:$0xf] }
  0x43   :  { %700 = vmatpush.bf16.msrb.mxu1 %v2038_v34  ;;  %394 = vmatmul.bf16.vlgmr.msra.gmra.mxu2 %v1990_v33  ;;  %v1829_v12 = vor.u32 %v2084_v10, %v1826_v11  ;;  %v182_v13 = vld [vmem:[#allocation7] sm:$0xf]  ;;  %v1768_v6 = vld [vmem:[#allocation10 + $0x80] sm:$0xf]  ;;  %v2073_v7 = vld [vmem:[#allocation10 + $0x8c] sm:$0xf0] }
  0x44   :  { %408 = vmatmul.bf16.vlgmr.msra.gmra.mxu3 %v1990_v33  ;;  %714 = vmatpush.bf16.msrb.mxu2 %v2046_v35  ;;  %v184_v15 = vperm.slane %v182_v13, 0  ;;  %v185_v17 = vperm.slane %v182_v13, 1  ;;  %v186_v27 = vperm.slane %v182_v13, 2  ;;  %v187_v29 = vperm.slane %v182_v13, 3  ;;  %v1770_v10 = vld [vmem:[#allocation10 + $0x90] sm:$0xf0] }
  0x45   :  { %728 = vmatpush.bf16.msrb.mxu3 %v2054_v37  ;;  %v1776_v11 = vld [vmem:[#allocation10 + $0x88] sm:$0xf] }
  0x46   :  { %687 = vmatpush.bf16.msrb.mxu0 %v2029_v36 }
  0x47   :  { %701 = vmatpush.bf16.msrb.mxu1 %v2037_v38 }
  0x48   :  { %715 = vmatpush.bf16.msrb.mxu2 %v2045_v39 }
  0x49   :  { %729 = vmatpush.bf16.msrb.mxu3 %v2053_v41 }
  0x4a   :  { %688 = vmatpush.bf16.msrb.mxu0 %v2028_v40 }
  0x4b   :  { %702 = vmatpush.bf16.msrb.mxu1 %v2036_v42 }
  0x4c   :  { %716 = vmatpush.bf16.msrb.mxu2 %v2044_v43 }
  0x4d   :  { %730 = vmatpush.bf16.msrb.mxu3 %v2052_v45 }
  0x4e   :  { %689 = vmatpush.bf16.msrb.mxu0 %v2027_v44 }
  0x4f   :  { %703 = vmatpush.bf16.msrb.mxu1 %v2035_v46  ;;  %v1800_v46 = vld [vmem:[#allocation10 + $0xc0] sm:$0xf] }
  0x50   :  { %717 = vmatpush.bf16.msrb.mxu2 %v2043_v49 }
  0x51   :  { %731 = vmatpush.bf16.msrb.mxu3 %v2051_v50  ;;  %v1802_v50 = vld [vmem:[#allocation10 + $0xd0] sm:$0xf0] }
  0x52   :  { %690 = vmatpush.bf16.msrb.mxu0 %v2026_v47  ;;  %v2081_v47 = vld [vmem:[#allocation10 + $0xcc] sm:$0xf0] }
  0x53   :  { %704 = vmatpush.bf16.msrb.mxu1 %v2034_v48  ;;  %v2079_v48 = vld [vmem:[#allocation10 + $0xc4] sm:$0xf]  ;;  %v1801_v49 = vor.u32 %v2081_v47, %v1800_v46  ;;  %v1722_v46 = vld [vmem:[#allocation10 + $0x30] sm:$0xf0]  ;;  %v1728_v47 = vld [vmem:[#allocation10 + $0x28] sm:$0xf] }
  0x54   :  { %718 = vmatpush.bf16.msrb.mxu2 %v2042_v53  ;;  %v1805_v53 = vor.u32 %v2079_v48, %v1802_v50  ;;  %v2062_v48 = vld [vmem:[#allocation10 + $0x34] sm:$0xf0] }
  0x55   :  { %732 = vmatpush.bf16.msrb.mxu3 %v2050_v54  ;;  %v1729_v50 = vor.u32 %v2062_v48, %v1728_v47  ;;  %v2088_v47 = vld [vmem:[#allocation11 + $0x8] sm:$0xff] }
  0x56   :  { %691 = vmatpush.bf16.msrb.mxu0 %v2025_v51  ;;  %v1808_v51 = vld [vmem:[#allocation10 + $0xc8] sm:$0xf] }
  0x57   :  { %705 = vmatpush.bf16.msrb.mxu1 %v2033_v52  ;;  %v2082_v52 = vld [vmem:[#allocation10 + $0xd4] sm:$0xf0]  ;;  %v2096_v48 = vld [vmem:[#allocation11 + $0x48] sm:$0xff] }
  0x58   :  { %719 = vmatpush.bf16.msrb.mxu2 %v2041_v57  ;;  %v1809_v54 = vor.u32 %v2082_v52, %v1808_v51  ;;  %v1784_v57 = vld [vmem:[#allocation10 + $0xa0] sm:$0xf]  ;;  %v2060_v51 = vld [vmem:[#allocation10 + $0x2c] sm:$0xf]  ;;  %v1730_v52 = vld [vmem:[#allocation10 + $0x38] sm:$0xf0] }
  0x59   :  { %733 = vmatpush.bf16.msrb.mxu3 %v2049_v58 }
  0x5a   :  { %692 = vmatpush.bf16.msrb.mxu0 %v2024_v55  ;;  %v2080_v55 = vld [vmem:[#allocation10 + $0xcc] sm:$0xf] }
  0x5b   :  { %706 = vmatpush.bf16.msrb.mxu1 %v2032_v56  ;;  %v1810_v56 = vld [vmem:[#allocation10 + $0xd8] sm:$0xf0] }
  0x5c   :  { %720 = vmatpush.bf16.msrb.mxu2 %v2040_v61  ;;  %v1813_v58 = vor.u32 %v2080_v55, %v1810_v56  ;;  %v1786_v61 = vld [vmem:[#allocation10 + $0xb0] sm:$0xf0]  ;;  %v2057_v55 = vld [vmem:[#allocation10 + $0xc] sm:$0xf0]  ;;  %v2055_v56 = vld [vmem:[#allocation10 + $0x4] sm:$0xf] }
  0x5d   :  { %734 = vmatpush.bf16.msrb.mxu3 %v2048_v62 }
  0x5e   :  { %693 = vmatpush.bf16.msrb.mxu0 %v2023_v59  ;;  %v2077_v59 = vld [vmem:[#allocation10 + $0xac] sm:$0xf0] }
  0x5f   :  { %707 = vmatpush.bf16.msrb.mxu1 %v2031_v60  ;;  %v2075_v60 = vld [vmem:[#allocation10 + $0xa4] sm:$0xf]  ;;  %v1785_v62 = vor.u32 %v2077_v59, %v1784_v57  ;;  %v1712_v59 = vld [vmem:[#allocation10 + $0x8] sm:$0xf] }
  0x60   :  { %721 = vmatpush.bf16.msrb.mxu2 %v2039_v63  ;;  %v1789_v63 = vor.u32 %v2075_v60, %v1786_v61  ;;  %v2058_v60 = vld [vmem:[#allocation10 + $0x14] sm:$0xf0] }
  0x61   :  { %735 = vmatpush.bf16.msrb.mxu3 %v2047_v0  ;;  %v1792_v0 = vld [vmem:[#allocation10 + $0xa8] sm:$0xf] }
  0x62   :  { %947 = vmatpush.bf16.msra.mxu0 %v1817_v4  ;;  %v1793_v3 = vor.u32 %v2078_v1, %v1792_v0  ;;  %v1794_v4 = vld [vmem:[#allocation10 + $0xb8] sm:$0xf0] }
  0x63   :  { %961 = vmatpush.bf16.msra.mxu1 %v1821_v8  ;;  %v1797_v5 = vor.u32 %v2076_v2, %v1794_v4  ;;  %v2071_v8 = vld [vmem:[#allocation10 + $0x84] sm:$0xf]  ;;  %v1714_v0 = vld [vmem:[#allocation10 + $0x18] sm:$0xf0] }
  0x64   :  { %975 = vmatpush.bf16.msra.mxu2 %v1825_v9  ;;  %v1769_v9 = vor.u32 %v2073_v7, %v1768_v6  ;;  %v1773_v13 = vor.u32 %v2071_v8, %v1770_v10  ;;  %v2094_v2 = vld [vmem:[#allocation11 + $0x38] sm:$0xff]  ;;  %v2093_v6 = vld [vmem:[#allocation11 + $0x30] sm:$0xff] }
  0x65   :  { %989 = vmatpush.bf16.msra.mxu3 %v1829_v12  ;;  %v2074_v12 = vld [vmem:[#allocation10 + $0x94] sm:$0xf0]  ;;  %v2101_v7 = vld [vmem:[#allocation11 + $0x70] sm:$0xff] }
  0x66   :  { %948 = vmatpush.bf16.msra.mxu0 %v1801_v49  ;;  %v2110_v4 = vld [vmem:[#allocation11 + $0xb8] sm:$0xff]  ;;  %v2109_v8 = vld [vmem:[#allocation11 + $0xb0] sm:$0xff] }
  0x67   :  { %962 = vmatpush.bf16.msra.mxu1 %v1805_v53  ;;  %v1733_v53 = vor.u32 %v2060_v51, %v1730_v52  ;;  %v2087_v51 = vld [vmem:[#allocation11] sm:$0xff] }
  0x68   :  { %976 = vmatpush.bf16.msra.mxu2 %v1809_v54  ;;  %v1704_v54 = vld [vmem:[#allocation10] sm:$0xf] }
  0x69   :  { %990 = vmatpush.bf16.msra.mxu3 %v1813_v58  ;;  %v1705_v57 = vor.u32 %v2057_v55, %v1704_v54  ;;  %v1706_v58 = vld [vmem:[#allocation10 + $0x10] sm:$0xf0]  ;;  %v2095_v52 = vld [vmem:[#allocation11 + $0x40] sm:$0xff]  ;;  %v2112_v54 = vld [vmem:[#allocation11 + $0xc8] sm:$0xff] }
  0x6a   :  { %949 = vmatpush.bf16.msra.mxu0 %v1785_v62  ;;  %v1709_v61 = vor.u32 %v2055_v56, %v1706_v58  ;;  %v1713_v62 = vor.u32 %v2058_v60, %v1712_v59  ;;  %v2103_v55 = vld [vmem:[#allocation11 + $0x80] sm:$0xff]  ;;  %v777_v58 = vld [vmem:[%s2492_s6] sm:$0xf] }
  0x6b   :  { %963 = vmatpush.bf16.msra.mxu1 %v1789_v63  ;;  %v2056_v63 = vld [vmem:[#allocation10 + $0xc] sm:$0xf]  ;;  %v2111_v56 = vld [vmem:[#allocation11 + $0xc0] sm:$0xff] }
  0x6c   :  { %977 = vmatpush.bf16.msra.mxu2 %v1793_v3  ;;  %v1717_v1 = vor.u32 %v2056_v63, %v1714_v0  ;;  %v2102_v3 = vld [vmem:[#allocation11 + $0x78] sm:$0xff] }
  0x6d   :  { %991 = vmatpush.bf16.msra.mxu3 %v1797_v5  ;;  %v2118_v5 = vld [vmem:[#allocation11 + $0xf8] sm:$0xff] }
  0x6e   :  { %950 = vmatpush.bf16.msra.mxu0 %v1769_v9  ;;  %v2117_v9 = vld [vmem:[#allocation11 + $0xf0] sm:$0xff] }
  0x6f   :  { %964 = vmatpush.bf16.msra.mxu1 %v1773_v13  ;;  %v2108_v13 = vld [vmem:[#allocation11 + $0xa8] sm:$0xff] }
  0xbe   :  { %v367_v14 = vpop.f32.mrf.mxu0 }
  0xbf   :  { %v381_v16 = vpop.f32.mrf.mxu1  ;;  %v368_v18 = vadd.f32 %v367_v14, %v184_v15  ;;  %v1777_v14 = vor.u32 %v2074_v12, %v1776_v11  ;;  %v2092_v11 = vld [vmem:[#allocation11 + $0x28] sm:$0xff] }
  0xc0   :  { %v382_v19 = vadd.f32 %v381_v16, %v185_v17  ;;  %v1778_v16 = vld [vmem:[#allocation10 + $0x98] sm:$0xf0]  ;;  %v2100_v12 = vld [vmem:[#allocation11 + $0x68] sm:$0xff] }
  0xc1   :  { %v414_v23 = vmax.f32 %v368_v18, 0.0  ;;  %978 = vmatpush.bf16.msra.mxu2 %v1777_v14  ;;  %v1752_v18 = vld [vmem:[#allocation10 + $0x60] sm:$0xf]  ;;  %v2116_v14 = vld [vmem:[#allocation11 + $0xe8] sm:$0xff] }
  0xc2   :  { %v415_v26 = vmax.f32 %v382_v19, 0.0  ;;  %v2069_v19 = vld [vmem:[#allocation10 + $0x6c] sm:$0xf0] }
  0xc6   :  { %v395_v20 = vpop.f32.mrf.mxu2  ;;  %v369_v22 = vpop.f32.mrf.mxu0 }
  0xc7   :  { %v409_v21 = vpop.f32.mrf.mxu3  ;;  %v370_v24 = vadd.f32 %v369_v22, %v184_v15  ;;  %v383_v25 = vpop.f32.mrf.mxu1  ;;  %v396_v33 = vadd.f32 %v395_v20, %v186_v27  ;;  %v2072_v15 = vld [vmem:[#allocation10 + $0x8c] sm:$0xf]  ;;  %v2067_v20 = vld [vmem:[#allocation10 + $0x64] sm:$0xf]  ;;  %v1754_v22 = vld [vmem:[#allocation10 + $0x70] sm:$0xf0] }
  0xc8   :  { %v384_v28 = vadd.f32 %v383_v25, %v185_v17  ;;  %v410_v35 = vadd.f32 %v409_v21, %v187_v29  ;;  %v1781_v17 = vor.u32 %v2072_v15, %v1778_v16  ;;  %v1753_v21 = vor.u32 %v2069_v19, %v1752_v18  ;;  %v2070_v25 = vld [vmem:[#allocation10 + $0x74] sm:$0xf0]  ;;  %v2144_v15 = vld [vmem:[%s2490_s4] ss:$0 sm:$0xff]  ;;  %v2099_v18 = vld [vmem:[#allocation11 + $0x60] sm:$0xff] }
  0xc9   :  { %v418_v30 = vmax.f32 %v370_v24, 0.0  ;;  %v416_v40 = vmax.f32 %v396_v33, 0.0  ;;  %v1757_v24 = vor.u32 %v2067_v20, %v1754_v22 }
  0xca   :  { %v419_v31 = vmax.f32 %v384_v28, 0.0  ;;  %v417_v42 = vmax.f32 %v410_v35, 0.0  ;;  %992 = vmatpush.bf16.msra.mxu3 %v1781_v17  ;;  %951 = vmatpush.bf16.msra.mxu0 %v1753_v21  ;;  %v1744_v35 = vld [vmem:[#allocation10 + $0x48] sm:$0xf]  ;;  %v2091_v17 = vld [vmem:[#allocation11 + $0x20] sm:$0xff] }
  0xcb   :  { %v422_v32 = vpack.c.bf16 %v418_v30, %v414_v23  ;;  %v1760_v23 = vld [vmem:[#allocation10 + $0x68] sm:$0xf]  ;;  %965 = vmatpush.bf16.msra.mxu1 %v1757_v24  ;;  %v1736_v30 = vld [vmem:[#allocation10 + $0x40] sm:$0xf] }
  0xcc   :  { %v423_v34 = vpack.c.bf16 %v419_v31, %v415_v26  ;;  %v2068_v26 = vld [vmem:[#allocation10 + $0x6c] sm:$0xf]  ;;  %v1761_v28 = vor.u32 %v2070_v25, %v1760_v23  ;;  %v2065_v31 = vld [vmem:[#allocation10 + $0x4c] sm:$0xf0] }
  0xcd   :  { %694 = vmatmul.bf16.vlgmr.msrb.gmra.mxu0 %v422_v32  ;;  %v2063_v32 = vld [vmem:[#allocation10 + $0x44] sm:$0xf]  ;;  %v1737_v33 = vor.u32 %v2065_v31, %v1736_v30 }
  0xce   :  { %v397_v36 = vpop.f32.mrf.mxu2  ;;  %708 = vmatmul.bf16.vlgmr.msrb.gmra.mxu1 %v423_v34  ;;  %979 = vmatpush.bf16.msra.mxu2 %v1761_v28  ;;  %v1738_v34 = vld [vmem:[#allocation10 + $0x50] sm:$0xf0] }
  0xcf   :  { %v398_v37 = vadd.f32 %v397_v36, %v186_v27  ;;  %v411_v38 = vpop.f32.mrf.mxu3  ;;  %v1762_v27 = vld [vmem:[#allocation10 + $0x78] sm:$0xf0]  ;;  %v2066_v36 = vld [vmem:[#allocation10 + $0x54] sm:$0xf0]  ;;  %952 = vmatpush.bf16.msra.mxu0 %v1737_v33 }
  0xd0   :  { %v412_v39 = vadd.f32 %v411_v38, %v187_v29  ;;  %v1765_v29 = vor.u32 %v2068_v26, %v1762_v27  ;;  %v1745_v38 = vor.u32 %v2066_v36, %v1744_v35  ;;  %v146_v27 = vld [vmem:[#allocation2] sm:$0xff]  }
  0xd1   :  { %v420_v41 = vmax.f32 %v398_v37, 0.0  ;;  %v1741_v37 = vor.u32 %v2063_v32, %v1738_v34  ;;  %v148_v30 = vunpack.c.l.bf16 %v146_v27  ;;  %v149_v33 = vunpack.c.h.bf16 %v146_v27  ;;  %v2125_v27 = vld [vmem:[#allocation13 + $0x30] sm:$0xff] }
  0xd2   :  { %v421_v43 = vmax.f32 %v412_v39, 0.0  ;;  %993 = vmatpush.bf16.msra.mxu3 %v1765_v29  ;;  %v2064_v39 = vld [vmem:[#allocation10 + $0x4c] sm:$0xf]  ;;  %980 = vmatpush.bf16.msra.mxu2 %v1745_v38 }
  0xd3   :  { %v424_v44 = vpack.c.bf16 %v420_v41, %v416_v40  ;;  %v1746_v40 = vld [vmem:[#allocation10 + $0x58] sm:$0xf0]  ;;  %966 = vmatpush.bf16.msra.mxu1 %v1741_v37 }
  0xd4   :  { %v425_v45 = vpack.c.bf16 %v421_v43, %v417_v42  ;;  %v1749_v41 = vor.u32 %v2064_v39, %v1746_v40  ;;  %v1720_v42 = vld [vmem:[#allocation10 + $0x20] sm:$0xf]  ;;  %v2061_v43 = vld [vmem:[#allocation10 + $0x2c] sm:$0xf0]  ;;  %v2090_v39 = vld [vmem:[#allocation11 + $0x18] sm:$0xff] }
  0xd5   :  { %722 = vmatmul.bf16.vlgmr.msrb.gmra.mxu2 %v424_v44  ;;  %v2059_v44 = vld [vmem:[#allocation10 + $0x24] sm:$0xf]  ;;  %v2098_v40 = vld [vmem:[#allocation11 + $0x58] sm:$0xff] }
  0xd6   :  { %736 = vmatmul.bf16.vlgmr.msrb.gmra.mxu3 %v425_v45  ;;  %v1721_v45 = vor.u32 %v2061_v43, %v1720_v42  ;;  %v1725_v49 = vor.u32 %v2059_v44, %v1722_v46  ;;  %981 = vmatpush.bf16.msra.mxu2 %v1729_v50  ;;  %v2115_v42 = vld [vmem:[#allocation11 + $0xe0] sm:$0xff]  ;;  %v2089_v43 = vld [vmem:[#allocation11 + $0x10] sm:$0xff]  ;;  %v2114_v46 = vld [vmem:[#allocation11 + $0xd8] sm:$0xff] }
  0xd7   :  { %994 = vmatpush.bf16.msra.mxu3 %v1749_v41  ;;  %v2107_v41 = vld [vmem:[#allocation11 + $0xa0] sm:$0xff]  ;;  %v2097_v44 = vld [vmem:[#allocation11 + $0x50] sm:$0xff] }
  0xd8   :  { %953 = vmatpush.bf16.msra.mxu0 %v1721_v45  ;;  %967 = vmatpush.bf16.msra.mxu1 %v1725_v49  ;;  %v2106_v45 = vld [vmem:[#allocation11 + $0x98] sm:$0xff]  ;;  %v2105_v49 = vld [vmem:[#allocation11 + $0x90] sm:$0xff] }
  0xd9   :  { %v2113_v50 = vld [vmem:[#allocation11 + $0xd0] sm:$0xff] }
  0xda   :  { %982 = vmatpush.bf16.msra.mxu2 %v1713_v62  ;;  %v780_v62 = vperm.slane %v777_v58, 1 }
  0xdb   :  { %995 = vmatpush.bf16.msra.mxu3 %v1733_v53  ;;  %v2104_v53 = vld [vmem:[#allocation11 + $0x88] sm:$0xff] }
  0xdc   :  { %954 = vmatpush.bf16.msra.mxu0 %v1705_v57  ;;  %968 = vmatpush.bf16.msra.mxu1 %v1709_v61  ;;  %v2126_v57 = vld [vmem:[#allocation13 + $0x38] sm:$0xff]  ;;  %v779_v61 = vperm.slane %v777_v58, 0 }
  0xde   :  { %1303 = vmatpush.bf16.msrb.mxu2 %v2110_v4 }
  0xdf   :  { %996 = vmatpush.bf16.msra.mxu3 %v1717_v1 }
  0xe0   :  { %1275 = vmatpush.bf16.msrb.mxu0 %v2094_v2  ;;  %1289 = vmatpush.bf16.msrb.mxu1 %v2102_v3 }
  0xe2   :  { %1304 = vmatpush.bf16.msrb.mxu2 %v2109_v8  ;;  %v782_v8 = vperm.slane %v777_v58, 3 }
  0xe3   :  { %1317 = vmatpush.bf16.msrb.mxu3 %v2118_v5 }
  0xe4   :  { %1276 = vmatpush.bf16.msrb.mxu0 %v2093_v6  ;;  %1290 = vmatpush.bf16.msrb.mxu1 %v2101_v7  ;;  %v781_v7 = vperm.slane %v777_v58, 2 }
  0xe6   :  { %1305 = vmatpush.bf16.msrb.mxu2 %v2108_v13 }
  0xe7   :  { %1318 = vmatpush.bf16.msrb.mxu3 %v2117_v9 }
  0xe8   :  { %1277 = vmatpush.bf16.msrb.mxu0 %v2092_v11  ;;  %1291 = vmatpush.bf16.msrb.mxu1 %v2100_v12 }
  0xea   :  { %1306 = vmatpush.bf16.msrb.mxu2 %v2107_v41 }
  0xeb   :  { %1319 = vmatpush.bf16.msrb.mxu3 %v2116_v14 }
  0xec   :  { %1278 = vmatpush.bf16.msrb.mxu0 %v2091_v17  ;;  %1292 = vmatpush.bf16.msrb.mxu1 %v2099_v18 }
  0xee   :  { %1307 = vmatpush.bf16.msrb.mxu2 %v2106_v45 }
  0xef   :  { %1320 = vmatpush.bf16.msrb.mxu3 %v2115_v42 }
  0xf0   :  { %1279 = vmatpush.bf16.msrb.mxu0 %v2090_v39  ;;  %1293 = vmatpush.bf16.msrb.mxu1 %v2098_v40 }
  0xf2   :  { %1308 = vmatpush.bf16.msrb.mxu2 %v2105_v49 }
  0xf3   :  { %1321 = vmatpush.bf16.msrb.mxu3 %v2114_v46 }
  0xf4   :  { %1280 = vmatpush.bf16.msrb.mxu0 %v2089_v43  ;;  %1294 = vmatpush.bf16.msrb.mxu1 %v2097_v44 }
  0xf6   :  { %1309 = vmatpush.bf16.msrb.mxu2 %v2104_v53 }
  0xf7   :  { %1322 = vmatpush.bf16.msrb.mxu3 %v2113_v50 }
  0xf8   :  { %1281 = vmatpush.bf16.msrb.mxu0 %v2088_v47  ;;  %1295 = vmatpush.bf16.msrb.mxu1 %v2096_v48 }
  0xfa   :  { %1310 = vmatpush.bf16.msrb.mxu2 %v2103_v55 }
  0xfb   :  { %1323 = vmatpush.bf16.msrb.mxu3 %v2112_v54 }
  0xfc   :  { %1282 = vmatpush.bf16.msrb.mxu0 %v2087_v51  ;;  %1296 = vmatpush.bf16.msrb.mxu1 %v2095_v52 }
  0xff   :  { %1324 = vmatpush.bf16.msrb.mxu3 %v2111_v56 }
 0x14a   :  { %v695_v10 = vpop.f32.mrf.mxu0 }
 0x14b   :  { %v709_v16 = vpop.f32.mrf.mxu1  ;;  %v696_v19 = vadd.f32 %v2144_v15, %v695_v10 }
 0x14d   :  { %v710_v23 = vadd.f32 %v709_v16, %v696_v19 }
 0x152   :  { %v697_v20 = vpop.f32.mrf.mxu0 }
 0x153   :  { %v698_v24 = vadd.f32 %v2144_v15, %v697_v20  ;;  %v711_v26 = vpop.f32.mrf.mxu1 }
 0x155   :  { %v712_v28 = vadd.f32 %v711_v26, %v698_v24 }
 0x158   :  { %v723_v21 = vpop.f32.mrf.mxu2 }
 0x159   :  { %v737_v22 = vpop.f32.mrf.mxu3  ;;  %v724_v25 = vadd.f32 %v723_v21, %v710_v23 }
 0x15b   :  { %v738_v31 = vadd.f32 %v737_v22, %v724_v25 }
 0x15d   :  { %v2463_v36 = vadd.f32 %v738_v31, %v148_v30  ;;  %v2122_v30 = vld [vmem:[#allocation13 + $0x18] sm:$0xff]  ;;  %v2121_v31 = vld [vmem:[#allocation13 + $0x10] sm:$0xff] }
 0x160   :  { %v725_v29 = vpop.f32.mrf.mxu2 }
 0x161   :  { %v726_v32 = vadd.f32 %v725_v29, %v712_v28  ;;  %v739_v34 = vpop.f32.mrf.mxu3  ;;  %v2124_v28 = vld [vmem:[#allocation13 + $0x28] sm:$0xff]  ;;  %v2123_v29 = vld [vmem:[#allocation13 + $0x20] sm:$0xff] }
 0x163   :  { %v740_v35 = vadd.f32 %v739_v34, %v726_v32  ;;  %v2120_v32 = vld [vmem:[#allocation13 + $0x8] sm:$0xff] }
 0x165   :  { %v2465_v37 = vadd.f32 %v740_v35, %v149_v33  ;;  %v2119_v33 = vld [vmem:[#allocation13] sm:$0xff]  ;;  %v2145_v35 = vld [vmem:[%s2494_s8] ss:$0 sm:$0xff] }
 0x167   :  { %v744_v38 = vpack.c.bf16 %v2465_v37, %v2463_v36 }
 0x169   :  { %955 = vmatmul.bf16.vlgmr.msra.gmra.mxu0 %v744_v38  ;;  %969 = vmatmul.bf16.vlgmr.msra.gmra.mxu1 %v744_v38 }
 0x16a   :  { %983 = vmatmul.bf16.vlgmr.msra.gmra.mxu2 %v744_v38  ;;  %997 = vmatmul.bf16.vlgmr.msra.gmra.mxu3 %v744_v38 }
 0x16b   :  { %1402 = vmatpush.bf16.msra.mxu0 %v2126_v57  ;;  %v2146_v57 = vld [vmem:[%s2496_s10] ss:$0 sm:$0xff] }
 0x16f   :  { %1403 = vmatpush.bf16.msra.mxu0 %v2125_v27 }
 0x173   :  { %1404 = vmatpush.bf16.msra.mxu0 %v2124_v28 }
 0x177   :  { %1405 = vmatpush.bf16.msra.mxu0 %v2123_v29 }
 0x17b   :  { %1406 = vmatpush.bf16.msra.mxu0 %v2122_v30 }
 0x17f   :  { %1407 = vmatpush.bf16.msra.mxu0 %v2121_v31 }
 0x183   :  { %1408 = vmatpush.bf16.msra.mxu0 %v2120_v32 }
 0x187   :  { %1409 = vmatpush.bf16.msra.mxu0 %v2119_v33 }
 0x1e6   :  { %v956_v59 = vpop.f32.mrf.mxu0  ;;  %v970_v60 = vpop.f32.mrf.mxu1 }
 0x1e7   :  { %v957_v63 = vadd.f32 %v956_v59, %v779_v61  ;;  %v971_v0 = vadd.f32 %v970_v60, %v780_v62 }
 0x1e9   :  { %v1003_v9 = vmax.f32 %v957_v63, 0.0  ;;  %v1004_v10 = vmax.f32 %v971_v0, 0.0 }
 0x1ed   :  { %v984_v1 = vpop.f32.mrf.mxu2  ;;  %v998_v2 = vpop.f32.mrf.mxu3 }
 0x1ee   :  { %v958_v3 = vpop.f32.mrf.mxu0  ;;  %v972_v4 = vpop.f32.mrf.mxu1  ;;  %v985_v15 = vadd.f32 %v984_v1, %v781_v7  ;;  %v999_v16 = vadd.f32 %v998_v2, %v782_v8 }
 0x1ef   :  { %v959_v5 = vadd.f32 %v958_v3, %v779_v61  ;;  %v973_v6 = vadd.f32 %v972_v4, %v780_v62 }
 0x1f0   :  { %v1005_v21 = vmax.f32 %v985_v15, 0.0  ;;  %v1006_v22 = vmax.f32 %v999_v16, 0.0 }
 0x1f1   :  { %v1007_v11 = vmax.f32 %v959_v5, 0.0  ;;  %v1008_v12 = vmax.f32 %v973_v6, 0.0 }
 0x1f3   :  { %v1011_v13 = vpack.c.bf16 %v1007_v11, %v1003_v9  ;;  %v1012_v14 = vpack.c.bf16 %v1008_v12, %v1004_v10 }
 0x1f5   :  { %v986_v17 = vpop.f32.mrf.mxu2  ;;  %v1000_v18 = vpop.f32.mrf.mxu3  ;;  %1283 = vmatmul.bf16.vlgmr.msrb.gmra.mxu0 %v1011_v13  ;;  %1297 = vmatmul.bf16.vlgmr.msrb.gmra.mxu1 %v1012_v14 }
 0x1f6   :  { %v987_v19 = vadd.f32 %v986_v17, %v781_v7  ;;  %v1001_v20 = vadd.f32 %v1000_v18, %v782_v8 }
 0x1f8   :  { %v1009_v23 = vmax.f32 %v987_v19, 0.0  ;;  %v1010_v24 = vmax.f32 %v1001_v20, 0.0 }
 0x1fa   :  { %v1013_v25 = vpack.c.bf16 %v1009_v23, %v1005_v21  ;;  %v1014_v26 = vpack.c.bf16 %v1010_v24, %v1006_v22 }
 0x1fc   :  { %1311 = vmatmul.bf16.vlgmr.msrb.gmra.mxu2 %v1013_v25  ;;  %1325 = vmatmul.bf16.vlgmr.msrb.gmra.mxu3 %v1014_v26 }
 0x272   :  { %v1284_v34 = vpop.f32.mrf.mxu0  ;;  %v1298_v38 = vpop.f32.mrf.mxu1 }
 0x273   :  { %v1285_v39 = vadd.f32 %v2145_v35, %v1284_v34 }
 0x275   :  { %v1299_v43 = vadd.f32 %v1298_v38, %v1285_v39 }
 0x27a   :  { %v1286_v40 = vpop.f32.mrf.mxu0  ;;  %v1300_v46 = vpop.f32.mrf.mxu1 }
 0x27b   :  { %v1287_v44 = vadd.f32 %v2145_v35, %v1286_v40 }
 0x27d   :  { %v1301_v47 = vadd.f32 %v1300_v46, %v1287_v44 }
 0x27f   :  { %v1312_v41 = vpop.f32.mrf.mxu2  ;;  %v1326_v42 = vpop.f32.mrf.mxu3 }
 0x280   :  { %v1313_v45 = vadd.f32 %v1312_v41, %v1299_v43 }
 0x282   :  { %v1327_v49 = vadd.f32 %v1326_v42, %v1313_v45 }
 0x284   :  { %v1331_v53 = vadd.f32 %v1327_v49, %v2463_v36 }
 0x287   :  { %v1314_v48 = vpop.f32.mrf.mxu2  ;;  %v1328_v51 = vpop.f32.mrf.mxu3 }
 0x288   :  { %v1315_v50 = vadd.f32 %v1314_v48, %v1301_v47 }
 0x28a   :  { %v1329_v52 = vadd.f32 %v1328_v51, %v1315_v50 }
 0x28c   :  { %v1332_v54 = vadd.f32 %v1329_v52, %v2465_v37 }
 0x28e   :  { %v1333_v55 = vpack.c.bf16 %v1332_v54, %v1331_v53 }
 0x290   :  { %1410 = vmatmul.bf16.vlgmr.msra.gmra.mxu0 %v1333_v55 }
 0x30d   :  { %v1411_v56 = vpop.f32.mrf.mxu0 }
 0x30e   :  { %v1412_v59 = vadd.f32 %v2146_v57, %v1411_v56 }
 0x315   :  { %v1413_v58 = vpop.f32.mrf.mxu0 }
 0x316   :  { %v1414_v60 = vadd.f32 %v2146_v57, %v1413_v58 }
 0x318   :  { %v2130_v61 = vpack.c.bf16 %v1414_v60, %v1412_v59 }
 0x31a   :  { %2131 = vst [vmem:[#allocation14] sm:$0xff] %v2130_v61  }
 0x31b   :  { %1432 = dma.vmem_to_hbm [thread:$0]  %s1425_s17, 128, %s1427_s19, [#allocation4], %s2353_s12, %s2353_s12, %s2354_s13  }
 0x31c   :  { %2347 = dma.done.wait [#allocation4], 128  }
 0x31d   :  { %2348 = vsyncadd [#allocation4], 4294967168 }
 0x31e   :  { %1437 = vsyncpa [#allocation3], 1 }
 0x31f   :  { %1438 = vsyncpa [#allocation6], 1 }
 0x320   :  { %1439 = vsyncpa [#allocation9], 1 }
 0x321   :  { %1440 = vsyncpa [#allocation12], 1 }
 0x322   :  { %1441 = vsyncpa [#allocation4], 1 }

</bundles_post_ra>
